<compile_context>
chip_gen: v5e
topology: v5e:2x2
jax: 0.10.0
libtpu: 0.0.40
codegen_flags: <defaults>
</compile_context>

<pallas_src>
import functools

import jax
import jax.numpy as jnp
import numpy as np
from jax import lax
from jax.experimental import pallas as pl
from jax.experimental.pallas import tpu as pltpu


def _critic_kernel(x_ref, w1_ref, w2_ref, misc_ref, o_ref, *, chunk):
    # x_ref:    (row_tile, in_feats)  natural input layout (f32 or compute dtype)
    # w1_ref:   (h_feats, in_feats)   compute dtype (f32 default)
    # w2_ref:   (in_feats, h_feats)   compute dtype
    # misc_ref: (mx, 4) f32 packed constants: col0=b1, col1=b2, col2=w3, col3[0]=b3
    # o_ref:    (1, row_tile)         lane-dense output slab
    h_feats, in_feats = w1_ref.shape
    row_tile = o_ref.shape[1]
    cd = w1_ref.dtype

    w1 = w1_ref[...]
    w2 = w2_ref[...]
    b1 = misc_ref[0:h_feats, 0:1]        # (h_feats, 1)  f32
    b2 = misc_ref[0:in_feats, 1:2]       # (in_feats, 1) f32
    w3 = misc_ref[0:in_feats, 2:3]       # (in_feats, 1) f32
    b3 = misc_ref[0:1, 3:4]              # (1, 1)        f32

    def body(c, carry):
        r0 = pl.multiple_of(c * chunk, chunk)
        xc = x_ref[pl.ds(r0, chunk), :]                 # (chunk, in_feats)
        if xc.dtype != cd:
            xc = xc.astype(cd)                          # cast fused into the kernel

        # Layer 1: contract over in_feats; batch dim lands on the lane axis.
        h = lax.dot_general(w1, xc, (((1,), (1,)), ((), ())),
                            preferred_element_type=jnp.float32)   # (h_feats, chunk)
        h = jnp.maximum(h + b1, 0.0)                    # bias/ReLU in f32 (v5e-safe)

        # Layer 2: standard orientation, lane-dense activation.
        h = jnp.dot(w2, h.astype(cd),
                    preferred_element_type=jnp.float32)           # (in_feats, chunk)
        h = jnp.maximum(h + b2, 0.0)

        # Layer 3 on VPU + XLU (broadcast-mul + sublane reduction), exact f32 math.
        y = jnp.sum(h * w3, axis=0, keepdims=True) + b3           # (1, chunk)
        o_ref[:, pl.ds(r0, chunk)] = y.astype(o_ref.dtype)
        return carry

    lax.fori_loop(0, row_tile // chunk, body, 0, unroll=True)


def ginn_critic_forward(features, params, *, row_tile=4096, chunk=256,
                        compute_dtype=None, out_dtype=None, return_slab=False):
    """features: [N, in_feats] (natural layout). params in torch nn.Linear layout:
       w1 (h,in), b1 (h,), w2 (in,h), b2 (in,), w3 (1,in), b3 (1,)."""
    N, in_feats = features.shape
    h_feats, in_feats_w = params["w1"].shape
    assert in_feats_w == in_feats
    cd = jnp.dtype(compute_dtype) if compute_dtype is not None else features.dtype
    od = jnp.dtype(out_dtype) if out_dtype is not None else features.dtype

    # ---- tile selection: big tiles to amortize per-step overhead, but keep the
    # grid >= 2 so both v7x TensorCores get work ("parallel" grid axis). ----------
    n128 = pl.cdiv(N, 128) * 128
    cap = max(128, ((n128 // 2) // 128) * 128)
    rt = max(128, min(int(row_tile), cap, n128))
    ck = int(chunk)
    if rt % ck != 0:
        if rt > ck:
            rt = (rt // ck) * ck
        else:
            ck = rt
    grid = (pl.cdiv(N, rt),)       # ragged N handled by Pallas boundary clipping

    w1 = params["w1"].astype(cd)   # (h_feats, in_feats), resident
    w2 = params["w2"].astype(cd)   # (in_feats, h_feats), resident

    # Pack b1/b2/w3/b3 into one small f32 array -> 4 inputs total (fewer DMA
    # descriptors / buffers). Constant index_maps are not re-DMA'd across steps.
    mx = pl.cdiv(max(h_feats, in_feats), 8) * 8
    misc = jnp.zeros((mx, 4), jnp.float32)
    misc = misc.at[:h_feats, 0].set(params["b1"].astype(jnp.float32))
    misc = misc.at[:in_feats, 1].set(params["b2"].astype(jnp.float32))
    misc = misc.at[:in_feats, 2].set(params["w3"].astype(jnp.float32)[0])
    misc = misc.at[0, 3].set(params["b3"].astype(jnp.float32)[0])

    out = pl.pallas_call(
        functools.partial(_critic_kernel, chunk=ck),
        out_shape=jax.ShapeDtypeStruct((1, N), od),
        grid_spec=pltpu.PrefetchScalarGridSpec(
            num_scalar_prefetch=0,
            grid=grid,
            in_specs=[
                pl.BlockSpec((rt, in_feats), lambda i: (i, 0)),    # x tile, natural layout
                pl.BlockSpec((h_feats, in_feats), lambda i: (0, 0)),  # w1 (resident)
                pl.BlockSpec((in_feats, h_feats), lambda i: (0, 0)),  # w2 (resident)
                pl.BlockSpec((mx, 4), lambda i: (0, 0)),              # packed b1/b2/w3/b3
            ],
            out_specs=pl.BlockSpec((1, rt), lambda i: (0, i)),        # lane-dense output
        ),
        compiler_params=pltpu.CompilerParams(
            dimension_semantics=("parallel",),
        ),
    )(features, w1, w2, misc)

    if return_slab:
        return out                 # (1, N) lane-dense slab, no extra HLO pass
    return out.reshape(N, 1)       # bitcast reshape (row-major order unchanged)


def init_params(key, in_feats, h_feats):
    """torch.nn.Linear-style init and layout: W is (out, in), b is (out,)."""
    ks = jax.random.split(key, 6)

    def lin(kw, kb, fan_in, fan_out):
        bound = 1.0 / np.sqrt(fan_in)
        w = jax.random.uniform(kw, (fan_out, fan_in), jnp.float32, -bound, bound)
        b = jax.random.uniform(kb, (fan_out,), jnp.float32, -bound, bound)
        return w, b

    w1, b1 = lin(ks[0], ks[1], in_feats, h_feats)
    w2, b2 = lin(ks[2], ks[3], h_feats, in_feats)
    w3, b3 = lin(ks[4], ks[5], in_feats, 1)
    return {"w1": w1, "b1": b1, "w2": w2, "b2": b2, "w3": w3, "b3": b3}


def reference_forward(features, p):
    """Pure-JAX f32 reference mirroring the PyTorch module."""
    hp = lax.Precision.HIGHEST
    x = features.astype(jnp.float32)
    h = jnp.maximum(jnp.dot(x, p["w1"].T, precision=hp) + p["b1"], 0.0)
    h = jnp.maximum(jnp.dot(h, p["w2"].T, precision=hp) + p["b2"], 0.0)
    return jnp.dot(h, p["w3"].T, precision=hp) + p["b3"]


if __name__ == "__main__":
    key = jax.random.PRNGKey(0)
    k_x, k_p = jax.random.split(key)

    # Small MLP-critic shapes; N deliberately NOT a multiple of the row tile or of
    # 128 to exercise the boundary-block clipping path, and large enough for a
    # >=2-step grid.
    N, in_feats, h_feats = 1000, 16, 32
    features = jax.random.normal(k_x, (N, in_feats), jnp.float32)
    params = init_params(k_p, in_feats, h_feats)

    fwd = jax.jit(ginn_critic_forward)       # defaults: f32 compute, (N,1) return
    out = jax.block_until_ready(fwd(features, params))
    assert out.shape == (N, 1)

    ref = reference_forward(features, params)
    # Both sides are f32 with MXU accumulation; tolerance covers MXU f32 rounding.
    np.testing.assert_allclose(np.asarray(out), np.asarray(ref), rtol=2e-3, atol=2e-3)

    print("KERNEL_OK")
</pallas_src>

<mosaic_0001>
module attributes {stable_mosaic.version = 11 : i64} {
  func.func @_critic_kernel(%arg0: i32, %arg1: memref<512x16xf32, #tpu.memory_space<vmem>>, %arg2: memref<32x16xf32, #tpu.memory_space<vmem>>, %arg3: memref<16x32xf32, #tpu.memory_space<vmem>>, %arg4: memref<32x4xf32, #tpu.memory_space<vmem>>, %arg5: memref<1x512xf32, #tpu.memory_space<vmem>>) attributes {dimension_semantics = [#tpu.dimension_semantics<parallel>], iteration_bounds = array<i64: 2>, scalar_prefetch = 0 : i64, scratch_operands = 0 : i64, tpu.core_type = #tpu.core_type<tc>, window_params = [{transform_indices = @transform_0, window_bounds = array<i64: 512, 16>}, {pipeline_mode = #tpu.pipeline_mode<synchronous>, transform_indices = @transform_1, window_bounds = array<i64: 32, 16>}, {pipeline_mode = #tpu.pipeline_mode<synchronous>, transform_indices = @transform_2, window_bounds = array<i64: 16, 32>}, {pipeline_mode = #tpu.pipeline_mode<synchronous>, transform_indices = @transform_3, window_bounds = array<i64: 32, 4>}, {transform_indices = @transform_4, window_bounds = array<i64: 1, 512>}]} {
    %c0 = arith.constant 0 : index
    %c0_0 = arith.constant 0 : index
    %0 = vector.load %arg2[%c0, %c0_0] : memref<32x16xf32, #tpu.memory_space<vmem>>, vector<32x16xf32>
    %c0_1 = arith.constant 0 : index
    %c0_2 = arith.constant 0 : index
    %1 = vector.load %arg3[%c0_1, %c0_2] : memref<16x32xf32, #tpu.memory_space<vmem>>, vector<16x32xf32>
    %c0_3 = arith.constant 0 : index
    %c0_4 = arith.constant 0 : index
    %2 = vector.load %arg4[%c0_3, %c0_4] : memref<32x4xf32, #tpu.memory_space<vmem>>, vector<32x1xf32>
    %c0_5 = arith.constant 0 : index
    %c1 = arith.constant 1 : index
    %3 = vector.load %arg4[%c0_5, %c1] : memref<32x4xf32, #tpu.memory_space<vmem>>, vector<16x1xf32>
    %c0_6 = arith.constant 0 : index
    %c2 = arith.constant 2 : index
    %4 = vector.load %arg4[%c0_6, %c2] : memref<32x4xf32, #tpu.memory_space<vmem>>, vector<16x1xf32>
    %c0_7 = arith.constant 0 : index
    %c3 = arith.constant 3 : index
    %5 = vector.load %arg4[%c0_7, %c3] : memref<32x4xf32, #tpu.memory_space<vmem>>, vector<1x1xf32>
    %c0_i32 = arith.constant 0 : i32
    %c256_i32 = arith.constant 256 : i32
    %6 = arith.muli %c0_i32, %c256_i32 : i32
    %7 = tpu.assume_multiple %6, 256 : i32
    %8 = arith.index_cast %7 : i32 to index
    %c0_8 = arith.constant 0 : index
    %9 = vector.load %arg1[%8, %c0_8] : memref<512x16xf32, #tpu.memory_space<vmem>>, vector<256x16xf32>
    %cst = arith.constant dense<0.000000e+00> : vector<32x256xf32>
    %10 = tpu.matmul %0, %9, %cst {dimension_numbers = #tpu.dot_dimension_numbers<[1], [1], [0], [0], [0, 0, 1, 0], [], []>} : vector<32x16xf32>, vector<256x16xf32>, vector<32x256xf32> -> vector<32x256xf32>
    %11 = vector.broadcast %2 : vector<32x1xf32> to vector<32x256xf32>
    %12 = arith.addf %10, %11 : vector<32x256xf32>
    %cst_9 = arith.constant 0.000000e+00 : f32
    %13 = vector.broadcast %cst_9 : f32 to vector<32x256xf32>
    %14 = arith.maximumf %12, %13 : vector<32x256xf32>
    %cst_10 = arith.constant dense<0.000000e+00> : vector<16x256xf32>
    %15 = tpu.matmul %1, %14, %cst_10 {dimension_numbers = #tpu.dot_dimension_numbers<[1], [0], [0], [1], [0, 0, 1, 1], [], []>} : vector<16x32xf32>, vector<32x256xf32>, vector<16x256xf32> -> vector<16x256xf32>
    %16 = vector.broadcast %3 : vector<16x1xf32> to vector<16x256xf32>
    %17 = arith.addf %15, %16 : vector<16x256xf32>
    %cst_11 = arith.constant 0.000000e+00 : f32
    %18 = vector.broadcast %cst_11 : f32 to vector<16x256xf32>
    %19 = arith.maximumf %17, %18 : vector<16x256xf32>
    %20 = vector.broadcast %4 : vector<16x1xf32> to vector<16x256xf32>
    %21 = arith.mulf %19, %20 : vector<16x256xf32>
    %cst_12 = arith.constant dense<0.000000e+00> : vector<256xf32>
    %22 = vector.multi_reduction <add>, %21, %cst_12 [0] : vector<16x256xf32> to vector<256xf32>
    %23 = vector.shape_cast %22 : vector<256xf32> to vector<1x256xf32>
    %24 = vector.broadcast %5 : vector<1x1xf32> to vector<1x256xf32>
    %25 = arith.addf %23, %24 : vector<1x256xf32>
    %c0_13 = arith.constant 0 : index
    %26 = arith.index_cast %7 : i32 to index
    %27 = vector.load %arg5[%c0_13, %26] : memref<1x512xf32, #tpu.memory_space<vmem>>, vector<1x256xf32>
    tpu.vector_store %arg5[%c0_13, %26], %25 {strides = array<i32>} : memref<1x512xf32, #tpu.memory_space<vmem>>, vector<1x256xf32>,
    %c1_i32 = arith.constant 1 : i32
    %c256_i32_14 = arith.constant 256 : i32
    %28 = arith.muli %c1_i32, %c256_i32_14 : i32
    %29 = tpu.assume_multiple %28, 256 : i32
    %30 = arith.index_cast %29 : i32 to index
    %c0_15 = arith.constant 0 : index
    %31 = vector.load %arg1[%30, %c0_15] : memref<512x16xf32, #tpu.memory_space<vmem>>, vector<256x16xf32>
    %cst_16 = arith.constant dense<0.000000e+00> : vector<32x256xf32>
    %32 = tpu.matmul %0, %31, %cst_16 {dimension_numbers = #tpu.dot_dimension_numbers<[1], [1], [0], [0], [0, 0, 1, 0], [], []>} : vector<32x16xf32>, vector<256x16xf32>, vector<32x256xf32> -> vector<32x256xf32>
    %33 = vector.broadcast %2 : vector<32x1xf32> to vector<32x256xf32>
    %34 = arith.addf %32, %33 : vector<32x256xf32>
    %cst_17 = arith.constant 0.000000e+00 : f32
    %35 = vector.broadcast %cst_17 : f32 to vector<32x256xf32>
    %36 = arith.maximumf %34, %35 : vector<32x256xf32>
    %cst_18 = arith.constant dense<0.000000e+00> : vector<16x256xf32>
    %37 = tpu.matmul %1, %36, %cst_18 {dimension_numbers = #tpu.dot_dimension_numbers<[1], [0], [0], [1], [0, 0, 1, 1], [], []>} : vector<16x32xf32>, vector<32x256xf32>, vector<16x256xf32> -> vector<16x256xf32>
    %38 = vector.broadcast %3 : vector<16x1xf32> to vector<16x256xf32>
    %39 = arith.addf %37, %38 : vector<16x256xf32>
    %cst_19 = arith.constant 0.000000e+00 : f32
    %40 = vector.broadcast %cst_19 : f32 to vector<16x256xf32>
    %41 = arith.maximumf %39, %40 : vector<16x256xf32>
    %42 = vector.broadcast %4 : vector<16x1xf32> to vector<16x256xf32>
    %43 = arith.mulf %41, %42 : vector<16x256xf32>
    %cst_20 = arith.constant dense<0.000000e+00> : vector<256xf32>
    %44 = vector.multi_reduction <add>, %43, %cst_20 [0] : vector<16x256xf32> to vector<256xf32>
    %45 = vector.shape_cast %44 : vector<256xf32> to vector<1x256xf32>
    %46 = vector.broadcast %5 : vector<1x1xf32> to vector<1x256xf32>
    %47 = arith.addf %45, %46 : vector<1x256xf32>
    %c0_21 = arith.constant 0 : index
    %48 = arith.index_cast %29 : i32 to index
    %49 = vector.load %arg5[%c0_21, %48] : memref<1x512xf32, #tpu.memory_space<vmem>>, vector<1x256xf32>
    tpu.vector_store %arg5[%c0_21, %48], %47 {strides = array<i32>} : memref<1x512xf32, #tpu.memory_space<vmem>>, vector<1x256xf32>,
    %c2_i32 = arith.constant 2 : i32
    return
  }
  func.func @transform_0(%arg0: i32) -> (i32, i32) {
    %c0_i32 = arith.constant 0 : i32
    %c0_i32_0 = arith.constant 0 : i32
    return %arg0, %c0_i32 : i32, i32
  }
  func.func @transform_1(%arg0: i32) -> (i32, i32) {
    %c0_i32 = arith.constant 0 : i32
    %c0_i32_0 = arith.constant 0 : i32
    %c0_i32_1 = arith.constant 0 : i32
    return %c0_i32, %c0_i32_0 : i32, i32
  }
  func.func @transform_2(%arg0: i32) -> (i32, i32) {
    %c0_i32 = arith.constant 0 : i32
    %c0_i32_0 = arith.constant 0 : i32
    %c0_i32_1 = arith.constant 0 : i32
    return %c0_i32, %c0_i32_0 : i32, i32
  }
  func.func @transform_3(%arg0: i32) -> (i32, i32) {
    %c0_i32 = arith.constant 0 : i32
    %c0_i32_0 = arith.constant 0 : i32
    %c0_i32_1 = arith.constant 0 : i32
    return %c0_i32, %c0_i32_0 : i32, i32
  }
  func.func @transform_4(%arg0: i32) -> (i32, i32) {
    %c0_i32 = arith.constant 0 : i32
    %c0_i32_0 = arith.constant 0 : i32
    return %c0_i32, %arg0 : i32, i32
  }
}

</mosaic_0001>

<bundles_post_ra>
// kernel: ginn_critic_forward.1
= control target key start
LH: loop header
LB: loop body
LE: loop exit
PB: predicated region body
PF: predicated region fallthrough
CT: control target
= control target key end

     0   :  { %9 = vsyncpa [#allocation3], 0  ;;  %s1578_s0 = inlined_call_operand.vmem [shape: f32[1000,16], index: 0, kind: input, shape index: {}]   ;;  %s1579_s1 = inlined_call_operand.vmem [shape: f32[32,16], index: 1, kind: input, shape index: {}]   ;;  %s1580_s2 = inlined_call_operand.vmem [shape: f32[16,32], index: 2, kind: input, shape index: {}]   ;;  %s1581_s3 = inlined_call_operand.vmem [shape: f32[32,4], index: 3, kind: input, shape index: {}]   ;;  %s1582_s4 = inlined_call_operand.hbm [shape: f32[1,1000], index: 4, kind: output, shape index: {}]  }
   0x1   :  { %11 = vsyncpa [#allocation3 + $0x1], 0  ;;  %s1188_s15 = smov 0   ;;  %s1190_s16 = smov 0  }
   0x2   :  { %s1192_s17 = smov 0   ;;  %s1194_s18 = smov 0  }
   0x3 LB: > { %s1209_s19 = sadd.s32 4294967295, %s1157_s18   ;;  %s913_s20 = sadd.s32 4294967294, %s1157_s18   ;;  %s1157_s18 = sphi %s1194_s18, %s1590_s18   ;;  %s1153_s17 = sphi %s1192_s17, %s1589_s17   ;;  %s1149_s16 = sphi %s1190_s16, %s1588_s16   ;;  %s1145_s15 = sphi %s1188_s15, %s1587_s15  }
   0x4   : > { %s1213_s21 = sadd.s32 1, %s1157_s18   ;;  %s113_s22 = sadd.s32 1, %s1153_s17 }
   0x5   : > { %s110_s23 = ssub.s32 %s1157_s18, %s1213_s21  ;;  %p123_p0 = scmp.ne.s32.totalorder %s1153_s17, %s1149_s16 }
   0x6   : > { %p111_p1 = scmp.eq.s32.totalorder %s110_s23, 0  ;;  %p124_p2 = scmp.eq.s32.totalorder %s1209_s19, 1 }
   0x7   : > { %p129_p3 = scmp.ne.s32.totalorder %s1149_s16, %s1145_s15  ;;  %p130_p4 = scmp.eq.s32.totalorder %s913_s20, 1 }
   0x8   : > { %s1224_s24 = scalar_select %p111_p1, %s1153_s17, %s113_s22  }
   0x9   : > { %p1226_p5 = por %p124_p2, %p123_p0  ;;  %p1230_p6 = por %p130_p4, %p129_p3 }
   0xa   : > { %p916_p7 = scmp.ge.s32.totalorder %s1157_s18, 1  ;;  %p174_p8 = scmp.lt.s32.totalorder %s1157_s18, 3 }
   0xc   : > { %p175_p9 = pnand %p916_p7, %p174_p8 }
   0xd   : > { %s918_s27 = sshll.u32 (!%p175_p9), %s1209_s19, 6  ;;  %s1042_s14 = sshll.u32 (!%p175_p9), %s1209_s19, 2 }
   0xe   : > { %178 = sbr.rel (%p175_p9) target bundleno = 641 (0x281), region = 36  ;;  %p209_p10 = scmp.lt.s32.totalorder (!%p175_p9), %s918_s27, 124 }
   0xf   : > { %s849_s23 = scalar_lea.hbm (!%p175_p9), %s1582_s4, %s1042_s14  ;;  %s1115_s8 = scalar_lea.hbm (!%p175_p9), %s1582_s4, 8 }
  0x13   : > { %s1592_s27 = smov (!%p209_p10, %s918_s27), 124  ;;  %vm282_vm0 = vcmask 130048   ;;  %v1279_v18 = vld [vmem:[%s1581_s3 + $0x8] sm:$0xff]  ;;  %v1159_v21 = vmov 0   ;;  %v1293_v24 = vld [vmem:[%s1581_s3] sm:$0xff]  ;;  %v228_v29 = vld [vmem:[%s1581_s3 + $0x18] sm:$0xff] }
  0x14   : > { %s919_s28 = sshll.u32 %s1592_s27, 3  ;;  %1089 = vset.pattern.permute.xlu1 %v1159_v21  ;;  %1088 = vset.pattern.permute.xlu0 %v1159_v21  ;;  %v227_v34 = vld [vmem:[%s1581_s3 + $0x10] sm:$0xff]  ;;  %v1327_v37 = vld [vmem:[%s1579_s1] sm:$0xff]  ;;  %v1336_v38 = vld [vmem:[%s1579_s1 + $0x8] sm:$0xff]  ;;  %vm465_vm1 = vcmask 261120   ;;  %vm558_vm2 = vcmask 1040384  }
  0x15   : > { %s1240_s5 = scalar_lea.vmem %s1578_s0, %s919_s28  ;;  %269 = vperm.xlu1 %1089, %v1279_v18   ;;  %279 = vperm.xlu0 %1088, %v228_v29   ;;  %v1345_v39 = vld [vmem:[%s1579_s1 + $0x10] sm:$0xff]  ;;  %v1354_v40 = vld [vmem:[%s1579_s1 + $0x18] sm:$0xff]  ;;  %s853_s28 = sshll.u32 %s849_s23, 4  ;;  %s854_s28 = int_to_ptr.hbm [resolvable:$true] %s853_s28 }
  0x16   : > { %v245_v0 = vld [vmem:[%s1240_s5 + $0x78] sm:$0xff]  ;;  %v244_v2 = vld [vmem:[%s1240_s5 + $0x70] sm:$0xff]  ;;  %v243_v4 = vld [vmem:[%s1240_s5 + $0x68] sm:$0xff]  ;;  %s1109_s29 = sshra.s32 %s854_s28, 4  ;;  %s1110_s29 = int_to_ptr.hbm [resolvable:$true] %s1109_s29 }
  0x17   : > { %v261_v1 = vld [vmem:[%s1240_s5 + $0xf8] sm:$0xff]  ;;  %920 = vmatpush.xpose.msk.msra.mxu0 %vm282_vm0, %v245_v0  ;;  %v260_v3 = vld [vmem:[%s1240_s5 + $0xf0] sm:$0xff]  ;;  %v259_v5 = vld [vmem:[%s1240_s5 + $0xe8] sm:$0xff]  ;;  %s1111_s30 = scalar_lea.hbm %s1110_s29, 4  ;;  %p1116_p0 = scmp.lt.s32.totalorder %s1110_s29, %s1582_s4 }
  0x18   : > { %940 = vmatpush.xpose.msk.msra.mxu1 %vm282_vm0, %v261_v1  ;;  %v242_v6 = vld [vmem:[%s1240_s5 + $0x60] sm:$0xff]  ;;  %v241_v8 = vld [vmem:[%s1240_s5 + $0x58] sm:$0xff]  ;;  %v240_v10 = vld [vmem:[%s1240_s5 + $0x50] sm:$0xff]  ;;  %p1112_p11 = scmp.ne.s32.totalorder %s1110_s29, %s1111_s30  ;;  %p1117_p1 = scmp.lt.s32.totalorder %s1115_s8, %s1111_s30 }
  0x19   : > { %v258_v7 = vld [vmem:[%s1240_s5 + $0xe0] sm:$0xff]  ;;  %v257_v9 = vld [vmem:[%s1240_s5 + $0xd8] sm:$0xff]  ;;  %v256_v11 = vld [vmem:[%s1240_s5 + $0xd0] sm:$0xff] }
  0x1a   : > { %v239_v12 = vld [vmem:[%s1240_s5 + $0x48] sm:$0xff]  ;;  %v238_v14 = vld [vmem:[%s1240_s5 + $0x40] sm:$0xff]  ;;  %v237_v16 = vld [vmem:[%s1240_s5 + $0x38] sm:$0xff]  ;;  %p1113_p12 = pnand %p1112_p11, %p1226_p5  ;;  %p1118_p2 = por %p1117_p1, %p1116_p0 }
  0x1b   : > { %921 = vmatpush.xpose.msk.msra.mxu0 %vm282_vm0, %v244_v2  ;;  %v255_v13 = vld [vmem:[%s1240_s5 + $0xc8] sm:$0xff]  ;;  %v254_v15 = vld [vmem:[%s1240_s5 + $0xc0] sm:$0xff]  ;;  %v253_v17 = vld [vmem:[%s1240_s5 + $0xb8] sm:$0xff] }
  0x1c   : > { %941 = vmatpush.xpose.msk.msra.mxu1 %vm282_vm0, %v260_v3  ;;  %v236_v19 = vld [vmem:[%s1240_s5 + $0x30] sm:$0xff]  ;;  %v235_v22 = vld [vmem:[%s1240_s5 + $0x28] sm:$0xff]  ;;  %v234_v25 = vld [vmem:[%s1240_s5 + $0x20] sm:$0xff]  ;;  %p1114_p13 = pneg %p1113_p12 }
  0x1d   : > { %v252_v20 = vld [vmem:[%s1240_s5 + $0xb0] sm:$0xff]  ;;  %v251_v23 = vld [vmem:[%s1240_s5 + $0xa8] sm:$0xff]  ;;  %v250_v26 = vld [vmem:[%s1240_s5 + $0xa0] sm:$0xff]  ;;  %264 = vperm.xlu1 %1089, %v1293_v24   ;;  %274 = vperm.xlu0 %1088, %v227_v34   ;;  %v1161_v34 = vmov 1  }
  0x1e   : > { %v233_v27 = vld [vmem:[%s1240_s5 + $0x18] sm:$0xff]  ;;  %v232_v30 = vld [vmem:[%s1240_s5 + $0x10] sm:$0xff]  ;;  %v231_v32 = vld [vmem:[%s1240_s5 + $0x8] sm:$0xff]  ;;  %1090 = vset.pattern.permute.xlu2 %v1161_v34  ;;  %p1119_p3 = pnand %p1118_p2, %p1114_p13 }
  0x1f   : > { %922 = vmatpush.xpose.msk.msra.mxu0 %vm282_vm0, %v243_v4  ;;  %v249_v28 = vld [vmem:[%s1240_s5 + $0x98] sm:$0xff]  ;;  %v248_v31 = vld [vmem:[%s1240_s5 + $0x90] sm:$0xff]  ;;  %v247_v33 = vld [vmem:[%s1240_s5 + $0x88] sm:$0xff]  ;;  %458 = vperm.xlu2 %1090, %v1293_v24  }
  0x20   : > { %942 = vmatpush.xpose.msk.msra.mxu1 %vm282_vm0, %v259_v5  ;;  %v230_v35 = vld [vmem:[%s1240_s5] sm:$0xff]  ;;  %v979_v5 = vld [vmem:[%s1240_s5 + $0x178] sm:$0xff]  ;;  %v989_v21 = vld [vmem:[%s1240_s5 + $0x1c8] sm:$0xff] }
  0x21   : > { %v246_v36 = vld [vmem:[%s1240_s5 + $0x80] sm:$0xff]  ;;  %v986_v29 = vld [vmem:[%s1240_s5 + $0x1b0] sm:$0xff] }
  0x23   : > { %923 = vmatpush.xpose.msk.msra.mxu0 %vm282_vm0, %v242_v6  ;;  %v995_v6 = vld [vmem:[%s1240_s5 + $0x1f8] sm:$0xff] }
  0x24   : > { %943 = vmatpush.xpose.msk.msra.mxu1 %vm282_vm0, %v258_v7  ;;  %v1383_v7 = vld [vmem:[%s1580_s2] sm:$0xff] }
  0x27   : > { %924 = vmatpush.xpose.msk.msra.mxu0 %vm282_vm0, %v241_v8  ;;  %v978_v8 = vld [vmem:[%s1240_s5 + $0x170] sm:$0xff]  ;;  %462 = vperm.xlu2 %1090, %v1279_v18  }
  0x28   : > { %944 = vmatpush.xpose.msk.msra.mxu1 %vm282_vm0, %v257_v9  ;;  %v994_v9 = vld [vmem:[%s1240_s5 + $0x1f0] sm:$0xff] }
  0x2b   : > { %925 = vmatpush.xpose.msk.msra.mxu0 %vm282_vm0, %v240_v10  ;;  %v977_v10 = vld [vmem:[%s1240_s5 + $0x168] sm:$0xff] }
  0x2c   : > { %945 = vmatpush.xpose.msk.msra.mxu1 %vm282_vm0, %v256_v11  ;;  %v993_v11 = vld [vmem:[%s1240_s5 + $0x1e8] sm:$0xff] }
  0x2f   : > { %926 = vmatpush.xpose.msk.msra.mxu0 %vm282_vm0, %v239_v12  ;;  %v1400_v12 = vld [vmem:[%s1580_s2 + $0x8] sm:$0xff] }
  0x30   : > { %946 = vmatpush.xpose.msk.msra.mxu1 %vm282_vm0, %v255_v13  ;;  %v976_v13 = vld [vmem:[%s1240_s5 + $0x160] sm:$0xff] }
  0x33   : > { %927 = vmatpush.xpose.msk.msra.mxu0 %vm282_vm0, %v238_v14  ;;  %v992_v14 = vld [vmem:[%s1240_s5 + $0x1e0] sm:$0xff] }
  0x34   : > { %947 = vmatpush.xpose.msk.msra.mxu1 %vm282_vm0, %v254_v15  ;;  %v975_v15 = vld [vmem:[%s1240_s5 + $0x158] sm:$0xff] }
  0x37   : > { %928 = vmatpush.xpose.msk.msra.mxu0 %vm282_vm0, %v237_v16  ;;  %v991_v16 = vld [vmem:[%s1240_s5 + $0x1d8] sm:$0xff] }
  0x38   : > { %948 = vmatpush.xpose.msk.msra.mxu1 %vm282_vm0, %v253_v17  ;;  %v974_v17 = vld [vmem:[%s1240_s5 + $0x150] sm:$0xff] }
  0x3b   : > { %929 = vmatpush.xpose.msk.msra.mxu0 %vm282_vm0, %v236_v19  ;;  %v990_v19 = vld [vmem:[%s1240_s5 + $0x1d0] sm:$0xff] }
  0x3c   : > { %949 = vmatpush.xpose.msk.msra.mxu1 %vm282_vm0, %v252_v20  ;;  %v973_v20 = vld [vmem:[%s1240_s5 + $0x148] sm:$0xff] }
  0x3f   : > { %930 = vmatpush.xpose.msk.msra.mxu0 %vm282_vm0, %v235_v22  ;;  %v972_v22 = vld [vmem:[%s1240_s5 + $0x140] sm:$0xff] }
  0x40   : > { %950 = vmatpush.xpose.msk.msra.mxu1 %vm282_vm0, %v251_v23  ;;  %v988_v23 = vld [vmem:[%s1240_s5 + $0x1c0] sm:$0xff] }
  0x43   : > { %931 = vmatpush.xpose.msk.msra.mxu0 %vm282_vm0, %v234_v25  ;;  %v971_v25 = vld [vmem:[%s1240_s5 + $0x138] sm:$0xff] }
  0x44   : > { %951 = vmatpush.xpose.msk.msra.mxu1 %vm282_vm0, %v250_v26  ;;  %v987_v26 = vld [vmem:[%s1240_s5 + $0x1b8] sm:$0xff] }
  0x47   : > { %932 = vmatpush.xpose.msk.msra.mxu0 %vm282_vm0, %v233_v27  ;;  %v1160_v27 = vmov 2  }
  0x48   : > { %952 = vmatpush.xpose.msk.msra.mxu1 %vm282_vm0, %v249_v28  ;;  %1091 = vset.pattern.permute.xlu0 %v1160_v27  ;;  %v970_v28 = vld [vmem:[%s1240_s5 + $0x130] sm:$0xff] }
  0x49   : > { %1092 = vset.pattern.permute.xlu1 %v1160_v27  ;;  %523 = vperm.xlu0 %1091, %v1293_v24   ;;  %v965_v24 = vld [vmem:[%s1240_s5 + $0x108] sm:$0xff] }
  0x4a   : > { %527 = vperm.xlu1 %1092, %v1279_v18  }
  0x4b   : > { %933 = vmatpush.xpose.msk.msra.mxu0 %vm282_vm0, %v232_v30  ;;  %v969_v30 = vld [vmem:[%s1240_s5 + $0x128] sm:$0xff] }
  0x4c   : > { %953 = vmatpush.xpose.msk.msra.mxu1 %vm282_vm0, %v248_v31  ;;  %v985_v31 = vld [vmem:[%s1240_s5 + $0x1a8] sm:$0xff] }
  0x4f   : > { %934 = vmatpush.xpose.msk.msra.mxu0 %vm282_vm0, %v231_v32  ;;  %v968_v32 = vld [vmem:[%s1240_s5 + $0x120] sm:$0xff] }
  0x50   : > { %954 = vmatpush.xpose.msk.msra.mxu1 %vm282_vm0, %v247_v33  ;;  %v984_v33 = vld [vmem:[%s1240_s5 + $0x1a0] sm:$0xff] }
  0x53   : > { %935 = vmatpush.xpose.msk.msra.mxu0 %vm282_vm0, %v230_v35  ;;  %v967_v35 = vld [vmem:[%s1240_s5 + $0x118] sm:$0xff] }
  0x54   : > { %955 = vmatpush.xpose.msk.msra.mxu1 %vm282_vm0, %v246_v36  ;;  %v983_v36 = vld [vmem:[%s1240_s5 + $0x198] sm:$0xff] }
  0x56   : > { %936 = vmatmul.msk.f32.vlgmr.msra.gmra.mxu0 %vm282_vm0, %v1327_v37 }
  0x57   : > { %956 = vmatmul.msk.f32.vlgmr.msra.gmra.mxu1 %vm282_vm0, %v1327_v37 }
  0x5e   : > { %937 = vmatmul.msk.f32.gmra.mxu0 %vm282_vm0, %v1336_v38 }
  0x5f   : > { %957 = vmatmul.msk.f32.gmra.mxu1 %vm282_vm0, %v1336_v38 }
  0x66   : > { %938 = vmatmul.msk.f32.gmra.mxu0 %vm282_vm0, %v1345_v39 }
  0x67   : > { %958 = vmatmul.msk.f32.gmra.mxu1 %vm282_vm0, %v1345_v39 }
  0x6e   : > { %939 = vmatmul.msk.f32.gmra.mxu0 %vm282_vm0, %v1354_v40 }
  0x6f   : > { %959 = vmatmul.msk.f32.gmra.mxu1 %vm282_vm0, %v1354_v40 }
  0x79   : > { %v1481_v18 = vpop.permute.xlu2 %458 }
  0x87   : > { %v1360_v45 = vpop.permute.xlu0 %279  ;;  %v1362_v46 = vpop.permute.xlu1 %269 }
  0x8f   : > { %v1364_v49 = vpop.permute.xlu0 %274  ;;  %v1370_v56 = vpop.permute.xlu1 %264 }
  0xd3   : > { %v408_v41 = vpop.f32.mrf.mxu0 }
  0xd4   : > { %v437_v42 = vpop.f32.mrf.mxu1  ;;  %v409_v61 = vadd.f32 %v408_v41, %v1370_v56  ;;  %v966_v41 = vld [vmem:[%s1240_s5 + $0x110] sm:$0xff] }
  0xd5   : > { %v438_v62 = vadd.f32 %v437_v42, %v1370_v56  ;;  %v982_v42 = vld [vmem:[%s1240_s5 + $0x190] sm:$0xff] }
  0xd6   : > { %v449_v3 = vmax.f32 %v409_v61, 0.0  ;;  %v1489_v61 = vpop.permute.xlu0 %523 }
  0xd7   : > { %v450_v4 = vmax.f32 %v438_v62, 0.0  ;;  %v1491_v62 = vpop.permute.xlu1 %527 }
  0xdb   : > { %v411_v43 = vpop.f32.mrf.mxu0 }
  0xdc   : > { %v440_v44 = vpop.f32.mrf.mxu1  ;;  %v412_v57 = vadd.f32 %v411_v43, %v1362_v46  ;;  %v981_v43 = vld [vmem:[%s1240_s5 + $0x188] sm:$0xff] }
  0xdd   : > { %v441_v58 = vadd.f32 %v440_v44, %v1362_v46  ;;  %v229_v44 = vld [vmem:[%s1581_s3] sm:$0x1] }
  0xde   : > { %v451_v1 = vmax.f32 %v412_v57, 0.0 }
  0xdf   : > { %v452_v2 = vmax.f32 %v441_v58, 0.0 }
  0xe3   : > { %v414_v47 = vpop.f32.mrf.mxu0 }
  0xe4   : > { %v443_v48 = vpop.f32.mrf.mxu1  ;;  %v415_v52 = vadd.f32 %v414_v47, %v1364_v49  ;;  %v964_v47 = vld [vmem:[%s1240_s5 + $0x100] sm:$0xff] }
  0xe5   : > { %v444_v53 = vadd.f32 %v443_v48, %v1364_v49  ;;  %v980_v48 = vld [vmem:[%s1240_s5 + $0x180] sm:$0xff]  ;;  %s201_s5 = sand.u32 1, %s1149_s16  }
  0xe6   : > { %v453_v63 = vmax.f32 %v415_v52, 0.0  ;;  %s917_s12 = sshll.u32 %s201_s5, 2  ;;  %s839_s19 = scalar_lea.sflag [#allocation3], %s201_s5 }
  0xe7   : > { %v454_v0 = vmax.f32 %v444_v53, 0.0  ;;  %v1485_v53 = vpop.permute.xlu2 %462  ;;  %s1509_s13 = scalar_lea.vmem [#allocation2], %s917_s12 }
  0xe8   : > { %s851_s27 = sshll.u32 %s1509_s13, 4  ;;  %s852_s27 = int_to_ptr.vmem [resolvable:$true] %s851_s27 }
  0xeb   : > { %v417_v50 = vpop.f32.mrf.mxu0 }
  0xec   : > { %v446_v51 = vpop.f32.mrf.mxu1  ;;  %v418_v54 = vadd.f32 %v417_v50, %v1360_v45  ;;  %v1162_v50 = vmov 3  }
  0xed   : > { %v447_v55 = vadd.f32 %v446_v51, %v1360_v45  ;;  %1094 = vset.pattern.permute.xlu0 %v1162_v50  ;;  %1093 = vset.pattern.permute.xlu2 %v1162_v50 }
  0xee   : > { %v455_v59 = vmax.f32 %v418_v54, 0.0  ;;  %550 = vperm.xlu2 %1093, %v229_v44  }
  0xef   : > { %v456_v60 = vmax.f32 %v447_v55, 0.0 }
  0xf0   : > { %484 = vmatpush.msra.mxu2 %v455_v59 }
  0xf1   : > { %507 = vmatpush.msra.mxu3 %v456_v60 }
  0xf2   : > { %485 = vmatpush.msra.mxu2 %v453_v63 }
  0xf3   : > { %508 = vmatpush.msra.mxu3 %v454_v0 }
  0xf4   : > { %486 = vmatpush.msra.mxu2 %v451_v1 }
  0xf5   : > { %509 = vmatpush.msra.mxu3 %v452_v2 }
  0xf6   : > { %487 = vmatpush.msra.mxu2 %v449_v3 }
  0xf7   : > { %510 = vmatpush.msra.mxu3 %v450_v4  ;;  %960 = vmatmul.msk.f32.vlgmr.msra.gmra.mxu2 %vm465_vm1, %v1383_v7 }
  0xf8   : > { %996 = vmatpush.xpose.msk.msrb.mxu2 %vm282_vm0, %v979_v5  ;;  %962 = vmatmul.msk.f32.vlgmr.msra.gmra.mxu3 %vm465_vm1, %v1383_v7 }
  0xf9   : > { %1016 = vmatpush.xpose.msk.msrb.mxu3 %vm282_vm0, %v995_v6 }
  0xfc   : > { %997 = vmatpush.xpose.msk.msrb.mxu2 %vm282_vm0, %v978_v8 }
  0xfd   : > { %1017 = vmatpush.xpose.msk.msrb.mxu3 %vm282_vm0, %v994_v9 }
  0xff   : > { %961 = vmatmul.msk.f32.gmra.mxu2 %vm465_vm1, %v1400_v12 }
 0x100   : > { %998 = vmatpush.xpose.msk.msrb.mxu2 %vm282_vm0, %v977_v10  ;;  %963 = vmatmul.msk.f32.gmra.mxu3 %vm465_vm1, %v1400_v12 }
 0x101   : > { %1018 = vmatpush.xpose.msk.msrb.mxu3 %vm282_vm0, %v993_v11 }
 0x104   : > { %999 = vmatpush.xpose.msk.msrb.mxu2 %vm282_vm0, %v976_v13 }
 0x105   : > { %1019 = vmatpush.xpose.msk.msrb.mxu3 %vm282_vm0, %v992_v14 }
 0x108   : > { %1000 = vmatpush.xpose.msk.msrb.mxu2 %vm282_vm0, %v975_v15 }
 0x109   : > { %1020 = vmatpush.xpose.msk.msrb.mxu3 %vm282_vm0, %v991_v16 }
 0x10c   : > { %1001 = vmatpush.xpose.msk.msrb.mxu2 %vm282_vm0, %v974_v17 }
 0x10d   : > { %1021 = vmatpush.xpose.msk.msrb.mxu3 %vm282_vm0, %v990_v19 }
 0x110   : > { %1002 = vmatpush.xpose.msk.msrb.mxu2 %vm282_vm0, %v973_v20 }
 0x111   : > { %1022 = vmatpush.xpose.msk.msrb.mxu3 %vm282_vm0, %v989_v21 }
 0x114   : > { %1003 = vmatpush.xpose.msk.msrb.mxu2 %vm282_vm0, %v972_v22 }
 0x115   : > { %1023 = vmatpush.xpose.msk.msrb.mxu3 %vm282_vm0, %v988_v23 }
 0x118   : > { %1004 = vmatpush.xpose.msk.msrb.mxu2 %vm282_vm0, %v971_v25  ;;  %v561_v25 = vlaneseq }
 0x119   : > { %1024 = vmatpush.xpose.msk.msrb.mxu3 %vm282_vm0, %v987_v26 }
 0x11a   : > { %vm1505_vm3 = vcmp.lt.s32.totalorder %v561_v25, 256 }
 0x11c   : > { %1005 = vmatpush.xpose.msk.msrb.mxu2 %vm282_vm0, %v970_v28 }
 0x11d   : > { %1025 = vmatpush.xpose.msk.msrb.mxu3 %vm282_vm0, %v986_v29 }
 0x120   : > { %1006 = vmatpush.xpose.msk.msrb.mxu2 %vm282_vm0, %v969_v30 }
 0x121   : > { %1026 = vmatpush.xpose.msk.msrb.mxu3 %vm282_vm0, %v985_v31 }
 0x124   : > { %1007 = vmatpush.xpose.msk.msrb.mxu2 %vm282_vm0, %v968_v32 }
 0x125   : > { %1027 = vmatpush.xpose.msk.msrb.mxu3 %vm282_vm0, %v984_v33 }
 0x128   : > { %1008 = vmatpush.xpose.msk.msrb.mxu2 %vm282_vm0, %v967_v35 }
 0x129   : > { %1028 = vmatpush.xpose.msk.msrb.mxu3 %vm282_vm0, %v983_v36 }
 0x12c   : > { %1009 = vmatpush.xpose.msk.msrb.mxu2 %vm282_vm0, %v966_v41 }
 0x12d   : > { %1029 = vmatpush.xpose.msk.msrb.mxu3 %vm282_vm0, %v982_v42 }
 0x130   : > { %1010 = vmatpush.xpose.msk.msrb.mxu2 %vm282_vm0, %v965_v24 }
 0x131   : > { %1030 = vmatpush.xpose.msk.msrb.mxu3 %vm282_vm0, %v981_v43 }
 0x134   : > { %1011 = vmatpush.xpose.msk.msrb.mxu2 %vm282_vm0, %v964_v47 }
 0x135   : > { %1031 = vmatpush.xpose.msk.msrb.mxu3 %vm282_vm0, %v980_v48 }
 0x137   : > { %1012 = vmatmul.msk.f32.vlgmr.msrb.gmra.mxu2 %vm282_vm0, %v1327_v37 }
 0x138   : > { %1032 = vmatmul.msk.f32.vlgmr.msrb.gmra.mxu3 %vm282_vm0, %v1327_v37 }
 0x13f   : > { %1013 = vmatmul.msk.f32.gmra.mxu2 %vm282_vm0, %v1336_v38 }
 0x140   : > { %1033 = vmatmul.msk.f32.gmra.mxu3 %vm282_vm0, %v1336_v38 }
 0x147   : > { %1014 = vmatmul.msk.f32.gmra.mxu2 %vm282_vm0, %v1345_v39 }
 0x148   : > { %1034 = vmatmul.msk.f32.gmra.mxu3 %vm282_vm0, %v1345_v39  ;;  %v1498_v16 = vpop.permute.xlu2 %550 }
 0x14f   : > { %1015 = vmatmul.msk.f32.gmra.mxu2 %vm282_vm0, %v1354_v40 }
 0x150   : > { %1035 = vmatmul.msk.f32.gmra.mxu3 %vm282_vm0, %v1354_v40 }
 0x17a   : > { %v489_v51 = vpop.f32.mrf.mxu2 }
 0x17b   : > { %v512_v37 = vpop.f32.mrf.mxu3  ;;  %v490_v38 = vadd.f32 %v489_v51, %v1481_v18 }
 0x17c   : > { %v513_v52 = vadd.f32 %v512_v37, %v1481_v18 }
 0x17d   : > { %v518_v57 = vmax.f32 %v490_v38, 0.0 }
 0x17e   : > { %v519_v55 = vmax.f32 %v513_v52, 0.0 }
 0x17f   : > { %v530_v63 = vmul.f32 %v1489_v61, %v518_v57 }
 0x180   : > { %v531_v0 = vmul.f32 %v1489_v61, %v519_v55 }
 0x182   : > { %v492_v58 = vpop.f32.mrf.mxu2 }
 0x183   : > { %v515_v54 = vpop.f32.mrf.mxu3  ;;  %v493_v59 = vadd.f32 %v492_v58, %v1485_v53 }
 0x184   : > { %v516_v39 = vadd.f32 %v515_v54, %v1485_v53 }
 0x185   : > { %v520_v40 = vmax.f32 %v493_v59, 0.0 }
 0x186   : > { %v521_v60 = vmax.f32 %v516_v39, 0.0 }
 0x187   : > { %v532_v2 = vmul.f32 %v1491_v62, %v520_v40 }
 0x188   : > { %v533_v1 = vmul.f32 %v1491_v62, %v521_v60 }
 0x189   : > { %v534_v4 = vadd.f32 %v532_v2, %v530_v63 }
 0x18a   : > { %v541_v3 = vadd.f32 %v533_v1, %v531_v0 }
 0x18b   : > { %v535_v6 = vrot.slane %v534_v4, 4 }
 0x18c   : > { %v542_v5 = vrot.slane %v541_v3, 4 }
 0x18d   : > { %v536_v9 = vadd.f32 %v535_v6, %v534_v4 }
 0x18e   : > { %v543_v8 = vadd.f32 %v542_v5, %v541_v3 }
 0x18f   : > { %v537_v11 = vrot.slane %v536_v9, 2 }
 0x190   : > { %v544_v10 = vrot.slane %v543_v8, 2 }
 0x191   : > { %v538_v14 = vadd.f32 %v537_v11, %v536_v9 }
 0x192   : > { %v545_v13 = vadd.f32 %v544_v10, %v543_v8 }
 0x193   : > { %v539_v17 = vrot.slane %v538_v14, 1 }
 0x194   : > { %v546_v15 = vrot.slane %v545_v13, 1 }
 0x195   : > { %v540_v20 = vadd.f32 %v539_v17, %v538_v14 }
 0x196   : > { %v547_v19 = vadd.f32 %v546_v15, %v545_v13 }
 0x197   : > { %v553_v22 = vadd.f32 %v1498_v16, %v540_v20 }
 0x198   : > { %v554_v21 = vadd.f32 %v1498_v16, %v547_v19 }
 0x19a   : > { %v557_v23 = vrot.slane %v554_v21, 7 }
 0x19c   : > { %v559_v26 = vsel %vm558_vm2, %v553_v22, %v557_v23 }
 0x19d   : > { %565 = vst.msk [vmem:[%s1509_s13] sm:$0x3] %vm1505_vm3, %v559_v26 }
 0x1ba   : > { %v712_v28 = vpop.f32.mrf.mxu2 }
 0x1bb   : > { %v741_v29 = vpop.f32.mrf.mxu3  ;;  %v713_v50 = vadd.f32 %v712_v28, %v1370_v56 }
 0x1bc   : > { %v742_v37 = vadd.f32 %v741_v29, %v1370_v56 }
 0x1bd   : > { %v753_v54 = vmax.f32 %v713_v50, 0.0 }
 0x1c2   : > { %v715_v30 = vpop.f32.mrf.mxu2 }
 0x1c3   : > { %v744_v31 = vpop.f32.mrf.mxu3  ;;  %v716_v43 = vadd.f32 %v715_v30, %v1362_v46 }
 0x1c4   : > { %v745_v44 = vadd.f32 %v744_v31, %v1362_v46 }
 0x1c5   : > { %v755_v38 = vmax.f32 %v716_v43, 0.0 }
 0x1ca   : > { %v718_v32 = vpop.f32.mrf.mxu2 }
 0x1cb   : > { %v747_v33 = vpop.f32.mrf.mxu3  ;;  %v719_v36 = vadd.f32 %v718_v32, %v1364_v49 }
 0x1cc   : > { %v748_v41 = vadd.f32 %v747_v33, %v1364_v49  ;;  %v756_v49 = vmax.f32 %v745_v44, 0.0 }
 0x1cd   : > { %v757_v51 = vmax.f32 %v719_v36, 0.0 }
 0x1ce   : > { %v758_v52 = vmax.f32 %v748_v41, 0.0 }
 0x1d2   : > { %v721_v34 = vpop.f32.mrf.mxu2 }
 0x1d3   : > { %v750_v35 = vpop.f32.mrf.mxu3  ;;  %v722_v42 = vadd.f32 %v721_v34, %v1360_v45 }
 0x1d4   : > { %v751_v24 = vadd.f32 %v750_v35, %v1360_v45  ;;  %v754_v45 = vmax.f32 %v742_v37, 0.0 }
 0x1d5   : > { %v759_v47 = vmax.f32 %v722_v42, 0.0 }
 0x1d6   : > { %v760_v48 = vmax.f32 %v751_v24, 0.0 }
 0x1d7   : > { %773 = vmatpush.msrb.mxu0 %v759_v47 }
 0x1d8   : > { %796 = vmatpush.msrb.mxu1 %v760_v48 }
 0x1d9   : > { %774 = vmatpush.msrb.mxu0 %v757_v51 }
 0x1da   : > { %797 = vmatpush.msrb.mxu1 %v758_v52 }
 0x1db   : > { %775 = vmatpush.msrb.mxu0 %v755_v38 }
 0x1dc   : > { %798 = vmatpush.msrb.mxu1 %v756_v49 }
 0x1dd   : > { %776 = vmatpush.msrb.mxu0 %v753_v54 }
 0x1de   : > { %799 = vmatpush.msrb.mxu1 %v754_v45  ;;  %1036 = vmatmul.msk.f32.vlgmr.msrb.gmra.mxu0 %vm465_vm1, %v1383_v7 }
 0x1df   : > { %1038 = vmatmul.msk.f32.vlgmr.msrb.gmra.mxu1 %vm465_vm1, %v1383_v7 }
 0x1e6   : > { %1037 = vmatmul.msk.f32.gmra.mxu0 %vm465_vm1, %v1400_v12 }
 0x1e7   : > { %1039 = vmatmul.msk.f32.gmra.mxu1 %vm465_vm1, %v1400_v12 }
 0x25b   : > { %v778_v56 = vpop.f32.mrf.mxu0 }
 0x25c   : > { %v801_v46 = vpop.f32.mrf.mxu1  ;;  %v779_v57 = vadd.f32 %v778_v56, %v1481_v18 }
 0x25d   : > { %v802_v55 = vadd.f32 %v801_v46, %v1481_v18 }
 0x25e   : > { %v807_v60 = vmax.f32 %v779_v57, 0.0 }
 0x25f   : > { %v808_v59 = vmax.f32 %v802_v55, 0.0 }
 0x260   : > { %v811_v12 = vmul.f32 %v807_v60, %v1489_v61 }
 0x261   : > { %v812_v1 = vmul.f32 %v808_v59, %v1489_v61 }
 0x263   : > { %v781_v58 = vpop.f32.mrf.mxu0 }
 0x264   : > { %v804_v39 = vpop.f32.mrf.mxu1  ;;  %v782_v7 = vadd.f32 %v781_v58, %v1485_v53 }
 0x265   : > { %v805_v40 = vadd.f32 %v804_v39, %v1485_v53 }
 0x266   : > { %v809_v0 = vmax.f32 %v782_v7, 0.0 }
 0x267   : > { %v810_v63 = vmax.f32 %v805_v40, 0.0 }
 0x268   : > { %v813_v3 = vmul.f32 %v809_v0, %v1491_v62 }
 0x269   : > { %v814_v2 = vmul.f32 %v810_v63, %v1491_v62 }
 0x26a   : > { %v815_v4 = vadd.f32 %v813_v3, %v811_v12 }
 0x26b   : > { %v822_v18 = vadd.f32 %v814_v2, %v812_v1 }
 0x26c   : > { %v816_v6 = vrot.slane %v815_v4, 4 }
 0x26d   : > { %v823_v5 = vrot.slane %v822_v18, 4 }
 0x26e   : > { %v817_v9 = vadd.f32 %v816_v6, %v815_v4 }
 0x26f   : > { %v824_v8 = vadd.f32 %v823_v5, %v822_v18 }
 0x270   : > { %v818_v53 = vrot.slane %v817_v9, 2 }
 0x271   : > { %v825_v10 = vrot.slane %v824_v8, 2 }
 0x272   : > { %v819_v13 = vadd.f32 %v818_v53, %v817_v9 }
 0x273   : > { %v826_v11 = vadd.f32 %v825_v10, %v824_v8 }
 0x274   : > { %v820_v61 = vrot.slane %v819_v13, 1 }
 0x275   : > { %v827_v14 = vrot.slane %v826_v11, 1 }
 0x276   : > { %v821_v15 = vadd.f32 %v820_v61, %v819_v13 }
 0x277   : > { %v828_v62 = vadd.f32 %v827_v14, %v826_v11 }
 0x278   : > { %v829_v19 = vadd.f32 %v821_v15, %v1498_v16 }
 0x279   : > { %v830_v17 = vadd.f32 %v828_v62, %v1498_v16 }
 0x27b   : > { %v833_v20 = vrot.slane %v830_v17, 7 }
 0x27d   : > { %v834_v21 = vsel %vm558_vm2, %v829_v19, %v833_v20 }
 0x27e   : > { %1040 = vst.msk [vmem:[%s1509_s13 + $0x2] sm:$0x3] %vm1505_vm3, %v834_v21 }
 0x27f   : > { %1122 = shalt.err (!%p1119_p3)
}
 0x280   : > { %1045 = dma.vmem_to_hbm [thread:$0]  (%p1226_p5), %s852_s27, 64, %s854_s28, %s839_s19  }
 0x281 PF: > { %p1051_p4 = scmp.ge.s32.totalorder %s1157_s18, 2  ;;  %s865_s11 = sand.u32 1, %s1145_s15  }
 0x282   : > { %s866_s5 = scalar_lea.sflag [#allocation3], %s865_s11 }
 0x283   : > { %p1048_p7 = pnand %p1051_p4, %p1230_p6 }
 0x285   : > { %p1049_p8 = pneg %p1048_p7 }
 0x287   : > { %1140 = dma.done.wait (%p1049_p8), %s866_s5, 64  }
 0x288   : > { %1142 = vsyncadd (%p1049_p8), %s866_s5, 4294967232  ;;  %p14_p9 = scmp.ge.s32.totalorder %s1213_s21, 4   ;;  %s1587_s15 = smov %s1149_s16 }
 0x289   : > { %s1588_s16 = smov %s1153_s17  ;;  %s1589_s17 = smov %s1224_s24 }
 0x28a   : > { %s1590_s18 = smov %s1213_s21  ;;  %16 = sbr.rel (!%p14_p9) target bundleno = 3 (0x3), region = 73 }
 0x28f   :  { %872 = vsyncpa [#allocation3], 1 }
 0x290   :  { %874 = vsyncpa [#allocation3 + $0x1], 1 }

</bundles_post_ra>
